<compile_context>
chip_gen: v7x
topology: tpu7x:2x2x1
jax: 0.10.0
libtpu: 0.0.40
codegen_flags: <defaults>
</compile_context>

<pallas_src>
import functools

import jax
import jax.numpy as jnp
from jax.experimental import pallas as pl
from jax.experimental.pallas import tpu as pltpu


def _mlp_kernel(x_ref, w1_ref, b1_ref, w2_ref, b2_ref, o_ref):
    # In-kernel f32 -> bf16 cast (VPU op, hides under the MXU slot).
    x_bf = x_ref[...].astype(jnp.bfloat16)
    # Hidden layer: x @ W1 (bf16 operands, f32 MXU accumulation).
    h = jnp.dot(x_bf, w1_ref[...], preferred_element_type=jnp.float32)
    # Bias + ReLU in f32 on the VPU (v5e has no bf16 VALUs).
    h = jnp.maximum(h + b1_ref[...], 0.0)
    # Output layer: h @ W2 + b2 (hidden re-quantized to bf16 for the MXU;
    # accumulation stays f32).
    out = jnp.dot(h.astype(jnp.bfloat16), w2_ref[...],
                  preferred_element_type=jnp.float32)
    o_ref[...] = (out + b2_ref[...]).astype(o_ref.dtype)


def _round_up(n, m):
    return ((n + m - 1) // m) * m


def prepare_params(w1, b1, w2, b2):
    """One-time (registration-time) weight prep: pad to lane-dense widths and
    cast matmul operands to bf16.  NOT part of the per-call path."""
    D_in, H = w1.shape
    D_out = w2.shape[1]
    Hp = _round_up(H, 128)
    Dp_out = _round_up(D_out, 128)

    b1 = jnp.reshape(b1, (1, -1))   # accept 1-D (H,) or (1, H)
    b2 = jnp.reshape(b2, (1, -1))

    w1p = jnp.zeros((D_in, Hp), jnp.bfloat16).at[:, :H].set(
        w1.astype(jnp.bfloat16))
    b1p = jnp.zeros((1, Hp), jnp.float32).at[:, :H].set(b1)
    w2p = jnp.zeros((Hp, Dp_out), jnp.bfloat16).at[:H, :D_out].set(
        w2.astype(jnp.bfloat16))
    b2p = jnp.zeros((1, Dp_out), jnp.float32).at[:, :D_out].set(b2)
    return w1p, b1p, w2p, b2p


@functools.partial(jax.jit, static_argnames=("d_out", "block_b"))
def mlp_forward(x, w1p, b1p, w2p, b2p, *, d_out, block_b=256):
    """Per-call path: raw f32 x + pre-padded bf16 weights -> fused MLP."""
    B, D_in = x.shape
    Hp = w1p.shape[1]
    Dp_out = w2p.shape[1]

    # Batch padding only if B is not a multiple of block_b (no-op for B=256).
    Bp = _round_up(B, block_b)
    if Bp != B:
        x = jnp.zeros((Bp, D_in), x.dtype).at[:B, :].set(x)

    grid = (Bp // block_b,)

    # Honest accounting of what the kernel actually moves.
    flops = 2 * Bp * D_in * Hp + 2 * Bp * Hp * Dp_out + 2 * Bp * Hp + Bp * Dp_out
    bytes_accessed = (
        Bp * D_in * 4            # x stream (f32)
        + w1p.size * 2 + w2p.size * 2   # bf16 weights (VMEM-resident, one read)
        + b1p.size * 4 + b2p.size * 4   # f32 biases
        + Bp * Dp_out * 4        # output writeback (f32)
    )

    out_padded = pl.pallas_call(
        _mlp_kernel,
        out_shape=jax.ShapeDtypeStruct((Bp, Dp_out), jnp.float32),
        grid_spec=pltpu.PrefetchScalarGridSpec(
            num_scalar_prefetch=0,
            grid=grid,
            in_specs=[
                # x tile: last dim == full array dim (legal even though < 128).
                pl.BlockSpec((block_b, D_in), lambda i: (i, 0)),
                pl.BlockSpec((D_in, Hp), lambda i: (0, 0)),    # W1 (resident)
                pl.BlockSpec((1, Hp), lambda i: (0, 0)),       # b1 (resident)
                pl.BlockSpec((Hp, Dp_out), lambda i: (0, 0)),  # W2 (resident)
                pl.BlockSpec((1, Dp_out), lambda i: (0, 0)),   # b2 (resident)
            ],
            out_specs=pl.BlockSpec((block_b, Dp_out), lambda i: (i, 0)),
        ),
        compiler_params=pltpu.CompilerParams(
            dimension_semantics=("parallel",)),
        cost_estimate=pl.CostEstimate(
            flops=flops, transcendentals=0, bytes_accessed=bytes_accessed),
    )(x, w1p, b1p, w2p, b2p)

    # Slice batch/lane padding off outside the kernel (cheap at this size).
    return out_padded[:B, :d_out]


def reference_forward(x, w1, b1, w2, b2):
    h = jnp.maximum(x @ w1 + b1.reshape(1, -1), 0.0)
    return h @ w2 + b2.reshape(1, -1)


if __name__ == "__main__":
    # Small shapes implied by the wrapped ivy MLP module; B=256 -> one
    # 256-row batch tile (grid=(1,), MXU rows fully occupied on v6e/v7x).
    B, D_IN, H, D_OUT = 256, 32, 128, 32

    key = jax.random.PRNGKey(0)
    kx, k1, k2, k3, k4 = jax.random.split(key, 5)

    # Deterministic parameter init (what _assign_variables would register).
    x = jax.random.normal(kx, (B, D_IN), dtype=jnp.float32)
    w1 = jax.random.normal(k1, (D_IN, H), dtype=jnp.float32) * 0.1
    b1 = jax.random.normal(k2, (H,), dtype=jnp.float32) * 0.1
    w2 = jax.random.normal(k3, (H, D_OUT), dtype=jnp.float32) * 0.1
    b2 = jax.random.normal(k4, (D_OUT,), dtype=jnp.float32) * 0.1

    # One-time weight prep (registration-time, NOT per-call).
    w1p, b1p, w2p, b2p = jax.block_until_ready(prepare_params(w1, b1, w2, b2))

    out = mlp_forward(x, w1p, b1p, w2p, b2p, d_out=D_OUT)
    out = jax.block_until_ready(out)

    ref = reference_forward(x, w1, b1, w2, b2)
    assert out.shape == (B, D_OUT)
    # bf16 MXU operands -> looser tolerance than pure-f32 (intentional
    # inference-precision trade; gate if used for training).
    assert jnp.allclose(out, ref, atol=3e-2, rtol=3e-2), float(
        jnp.max(jnp.abs(out - ref)))

    # TODO(synk): the torch wrapper's param-registration / args_to_native
    # plumbing is framework glue with no compute; only _forward is kernelized.
    print("KERNEL_OK")
</pallas_src>

<mosaic_0001>
module attributes {stable_mosaic.version = 11 : i64} {
  func.func @_mlp_kernel(%arg0: i32, %arg1: memref<256x32xf32, #tpu.memory_space<vmem>>, %arg2: memref<32x128xbf16, #tpu.memory_space<vmem>>, %arg3: memref<1x128xf32, #tpu.memory_space<vmem>>, %arg4: memref<128x128xbf16, #tpu.memory_space<vmem>>, %arg5: memref<1x128xf32, #tpu.memory_space<vmem>>, %arg6: memref<256x128xf32, #tpu.memory_space<vmem>>) attributes {dimension_semantics = [#tpu.dimension_semantics<parallel>], iteration_bounds = array<i64: 1>, scalar_prefetch = 0 : i64, scratch_operands = 0 : i64, tpu.core_type = #tpu.core_type<tc>, window_params = [{transform_indices = @transform_0, window_bounds = array<i64: 256, 32>}, {pipeline_mode = #tpu.pipeline_mode<synchronous>, transform_indices = @transform_1, window_bounds = array<i64: 32, 128>}, {pipeline_mode = #tpu.pipeline_mode<synchronous>, transform_indices = @transform_2, window_bounds = array<i64: 1, 128>}, {pipeline_mode = #tpu.pipeline_mode<synchronous>, transform_indices = @transform_3, window_bounds = array<i64: 128, 128>}, {pipeline_mode = #tpu.pipeline_mode<synchronous>, transform_indices = @transform_4, window_bounds = array<i64: 1, 128>}, {transform_indices = @transform_5, window_bounds = array<i64: 256, 128>}]} {
    %c0 = arith.constant 0 : index
    %c0_0 = arith.constant 0 : index
    %0 = vector.load %arg1[%c0, %c0_0] : memref<256x32xf32, #tpu.memory_space<vmem>>, vector<256x32xf32>
    %1 = arith.truncf %0 : vector<256x32xf32> to vector<256x32xbf16>
    %c0_1 = arith.constant 0 : index
    %c0_2 = arith.constant 0 : index
    %2 = vector.load %arg2[%c0_1, %c0_2] : memref<32x128xbf16, #tpu.memory_space<vmem>>, vector<32x128xbf16>
    %cst = arith.constant dense<0.000000e+00> : vector<256x128xf32>
    %3 = tpu.matmul %1, %2, %cst {dimension_numbers = #tpu.dot_dimension_numbers<[1], [0], [0], [1], [0, 0, 1, 1], [], []>} : vector<256x32xbf16>, vector<32x128xbf16>, vector<256x128xf32> -> vector<256x128xf32>
    %c0_3 = arith.constant 0 : index
    %c0_4 = arith.constant 0 : index
    %4 = vector.load %arg3[%c0_3, %c0_4] : memref<1x128xf32, #tpu.memory_space<vmem>>, vector<1x128xf32>
    %5 = vector.broadcast %4 : vector<1x128xf32> to vector<256x128xf32>
    %6 = arith.addf %3, %5 : vector<256x128xf32>
    %cst_5 = arith.constant 0.000000e+00 : f32
    %7 = vector.broadcast %cst_5 : f32 to vector<256x128xf32>
    %8 = arith.maximumf %6, %7 : vector<256x128xf32>
    %9 = arith.truncf %8 : vector<256x128xf32> to vector<256x128xbf16>
    %c0_6 = arith.constant 0 : index
    %c0_7 = arith.constant 0 : index
    %10 = vector.load %arg4[%c0_6, %c0_7] : memref<128x128xbf16, #tpu.memory_space<vmem>>, vector<128x128xbf16>
    %cst_8 = arith.constant dense<0.000000e+00> : vector<256x128xf32>
    %11 = tpu.matmul %9, %10, %cst_8 {dimension_numbers = #tpu.dot_dimension_numbers<[1], [0], [0], [1], [0, 0, 1, 1], [], []>} : vector<256x128xbf16>, vector<128x128xbf16>, vector<256x128xf32> -> vector<256x128xf32>
    %c0_9 = arith.constant 0 : index
    %c0_10 = arith.constant 0 : index
    %12 = vector.load %arg5[%c0_9, %c0_10] : memref<1x128xf32, #tpu.memory_space<vmem>>, vector<1x128xf32>
    %13 = vector.broadcast %12 : vector<1x128xf32> to vector<256x128xf32>
    %14 = arith.addf %11, %13 : vector<256x128xf32>
    %c0_11 = arith.constant 0 : index
    %c0_12 = arith.constant 0 : index
    %15 = vector.load %arg6[%c0_11, %c0_12] : memref<256x128xf32, #tpu.memory_space<vmem>>, vector<256x128xf32>
    tpu.vector_store %arg6[%c0_11, %c0_12], %14 {strides = array<i32>} : memref<256x128xf32, #tpu.memory_space<vmem>>, vector<256x128xf32>,
    return
  }
  func.func @transform_0(%arg0: i32) -> (i32, i32) {
    %c0_i32 = arith.constant 0 : i32
    %c0_i32_0 = arith.constant 0 : i32
    return %arg0, %c0_i32 : i32, i32
  }
  func.func @transform_1(%arg0: i32) -> (i32, i32) {
    %c0_i32 = arith.constant 0 : i32
    %c0_i32_0 = arith.constant 0 : i32
    %c0_i32_1 = arith.constant 0 : i32
    return %c0_i32, %c0_i32_0 : i32, i32
  }
  func.func @transform_2(%arg0: i32) -> (i32, i32) {
    %c0_i32 = arith.constant 0 : i32
    %c0_i32_0 = arith.constant 0 : i32
    %c0_i32_1 = arith.constant 0 : i32
    return %c0_i32, %c0_i32_0 : i32, i32
  }
  func.func @transform_3(%arg0: i32) -> (i32, i32) {
    %c0_i32 = arith.constant 0 : i32
    %c0_i32_0 = arith.constant 0 : i32
    %c0_i32_1 = arith.constant 0 : i32
    return %c0_i32, %c0_i32_0 : i32, i32
  }
  func.func @transform_4(%arg0: i32) -> (i32, i32) {
    %c0_i32 = arith.constant 0 : i32
    %c0_i32_0 = arith.constant 0 : i32
    %c0_i32_1 = arith.constant 0 : i32
    return %c0_i32, %c0_i32_0 : i32, i32
  }
  func.func @transform_5(%arg0: i32) -> (i32, i32) {
    %c0_i32 = arith.constant 0 : i32
    %c0_i32_0 = arith.constant 0 : i32
    return %arg0, %c0_i32 : i32, i32
  }
}

</mosaic_0001>

<bundles_post_ra>
// kernel: mlp_forward.1
= control target key start
LH: loop header
LB: loop body
LE: loop exit
PB: predicated region body
PF: predicated region fallthrough
CT: control target
= control target key end

     0   :  { %vm92_vm0 = vcmask 261120   ;;  %s1140_s1 = inlined_call_operand.vmem [shape: bf16[32,128], index: 1, kind: input, shape index: {}]   ;;  %s1141_s0 = inlined_call_operand.vmem [shape: f32[256,32], index: 0, kind: input, shape index: {}]   ;;  %s1142_s3 = inlined_call_operand.vmem [shape: bf16[128,128], index: 3, kind: input, shape index: {}]   ;;  %s1143_s2 = inlined_call_operand.vmem [shape: f32[1,128], index: 2, kind: input, shape index: {}]   ;;  %s1144_s4 = inlined_call_operand.vmem [shape: f32[1,128], index: 4, kind: input, shape index: {}]   ;;  %s1145_s5 = inlined_call_operand.vmem [shape: f32[256,128], index: 5, kind: output, shape index: {}]  }
   0x1   :  { %v788_v0 = vld [vmem:[%s1140_s1] sm:$0xff]   ;;  %v789_v1 = vld [vmem:[%s1140_s1 + $0x8] sm:$0xff]   ;;  %v23_v5 = vld [vmem:[%s1141_s0 + $0x10] sm:$0xff] }
   0x2   :  { %688 = vmatprep.subr.bf16.mxu0 %v788_v0  ;;  %v21_v2 = vld [vmem:[%s1141_s0] sm:$0xff]  ;;  %v22_v3 = vld [vmem:[%s1141_s0 + $0x8] sm:$0xff]  ;;  %v24_v6 = vld [vmem:[%s1141_s0 + $0x18] sm:$0xff] }
   0x3   :  { %689 = vmatpush3.bf16.msra.mxu0 %v788_v0  ;;  %v53_v4 = vpack.c.bf16 %v22_v3, %v21_v2  ;;  %v25_v7 = vld [vmem:[%s1141_s0 + $0x20] sm:$0xff]  ;;  %v26_v8 = vld [vmem:[%s1141_s0 + $0x28] sm:$0xff]  ;;  %v54_v9 = vpack.c.bf16 %v24_v6, %v23_v5  ;;  %v27_v11 = vld [vmem:[%s1141_s0 + $0x30] sm:$0xff] }
   0x4   :  { %690 = vmatprep.subr.bf16.mxu0 %v789_v1  ;;  %v55_v10 = vpack.c.bf16 %v26_v8, %v25_v7  ;;  %v28_v12 = vld [vmem:[%s1141_s0 + $0x38] sm:$0xff]  ;;  %v29_v13 = vld [vmem:[%s1141_s0 + $0x40] sm:$0xff]  ;;  %v30_v14 = vld [vmem:[%s1141_s0 + $0x48] sm:$0xff] }
   0x5   :  { %692 = vmatprep.mubr.msk.bf16.mxu0 %vm92_vm0, %v53_v4  ;;  %v790_v15 = vld [vmem:[%s1142_s3] sm:$0xff]   ;;  %v56_v16 = vpack.c.bf16 %v28_v12, %v27_v11  ;;  %v791_v17 = vld [vmem:[%s1142_s3 + $0x8] sm:$0xff]   ;;  %v57_v18 = vpack.c.bf16 %v30_v14, %v29_v13  ;;  %v31_v19 = vld [vmem:[%s1141_s0 + $0x50] sm:$0xff] }
   0x6   :  { %772 = vmatprep.subr.bf16.mxu1 %v790_v15  ;;  %v792_v20 = vld [vmem:[%s1142_s3 + $0x10] sm:$0xff]   ;;  %v32_v21 = vld [vmem:[%s1141_s0 + $0x58] sm:$0xff]  ;;  %v33_v22 = vld [vmem:[%s1141_s0 + $0x60] sm:$0xff] }
   0x7   :  { %691 = vmatpush3.bf16.msra.mxu0 %v789_v1  ;;  %780 = vmatpush3.bf16.msra.mxu1 %v790_v15  ;;  %v34_v23 = vld [vmem:[%s1141_s0 + $0x68] sm:$0xff]  ;;  %v793_v24 = vld [vmem:[%s1142_s3 + $0x18] sm:$0xff]   ;;  %v58_v25 = vpack.c.bf16 %v32_v21, %v31_v19  ;;  %v794_v27 = vld [vmem:[%s1142_s3 + $0x20] sm:$0xff]  }
   0x8   :  { %724 = vmatprep.subr.bf16.mxu0 %v790_v15  ;;  %773 = vmatprep.subr.bf16.mxu1 %v791_v17  ;;  %v59_v26 = vpack.c.bf16 %v34_v23, %v33_v22  ;;  %v35_v28 = vld [vmem:[%s1141_s0 + $0x70] sm:$0xff]  ;;  %v36_v29 = vld [vmem:[%s1141_s0 + $0x78] sm:$0xff]  ;;  %v37_v30 = vld [vmem:[%s1141_s0 + $0x80] sm:$0xff] }
   0x9   :  { %v38_v31 = vld [vmem:[%s1141_s0 + $0x88] sm:$0xff]  ;;  %v60_v33 = vpack.c.bf16 %v36_v29, %v35_v28  ;;  %v39_v35 = vld [vmem:[%s1141_s0 + $0x90] sm:$0xff]  ;;  %v40_v36 = vld [vmem:[%s1141_s0 + $0x98] sm:$0xff] }
   0xa   :  { %693 = vmatmul.mubr.msk.bf16.vlgmr.msra.gmra.mrb[0].mxu0 %vm92_vm0, %v54_v9  ;;  %v795_v32 = vld [vmem:[%s1142_s3 + $0x28] sm:$0xff]   ;;  %v61_v34 = vpack.c.bf16 %v38_v31, %v37_v30  ;;  %v41_v37 = vld [vmem:[%s1141_s0 + $0xa0] sm:$0xff]  ;;  %v62_v39 = vpack.c.bf16 %v40_v36, %v39_v35  ;;  %v43_v41 = vld [vmem:[%s1141_s0 + $0xb0] sm:$0xff] }
   0xb   :  { %696 = vmatprep.mubr.msk.bf16.mxu0 %vm92_vm0, %v55_v10  ;;  %725 = vmatpush3.bf16.msra.mxu0 %v790_v15  ;;  %v42_v38 = vld [vmem:[%s1141_s0 + $0xa8] sm:$0xff]  ;;  %v44_v42 = vld [vmem:[%s1141_s0 + $0xb8] sm:$0xff]  ;;  %v45_v43 = vld [vmem:[%s1141_s0 + $0xc0] sm:$0xff] }
   0xc   :  { %726 = vmatprep.subr.bf16.mxu0 %v791_v17  ;;  %781 = vmatpush3.bf16.msra.mxu1 %v791_v17  ;;  %v63_v40 = vpack.c.bf16 %v42_v38, %v41_v37  ;;  %v46_v44 = vld [vmem:[%s1141_s0 + $0xc8] sm:$0xff]  ;;  %v64_v45 = vpack.c.bf16 %v44_v42, %v43_v41  ;;  %v47_v47 = vld [vmem:[%s1141_s0 + $0xd0] sm:$0xff]  ;;  %v48_v48 = vld [vmem:[%s1141_s0 + $0xd8] sm:$0xff] }
   0xd   :  { %774 = vmatprep.subr.bf16.mxu1 %v792_v20  ;;  %v65_v46 = vpack.c.bf16 %v46_v44, %v45_v43  ;;  %v49_v49 = vld [vmem:[%s1141_s0 + $0xe0] sm:$0xff]  ;;  %v50_v50 = vld [vmem:[%s1141_s0 + $0xe8] sm:$0xff]  ;;  %v66_v51 = vpack.c.bf16 %v48_v48, %v47_v47  ;;  %v51_v53 = vld [vmem:[%s1141_s0 + $0xf0] sm:$0xff] }
   0xe   :  { %v67_v52 = vpack.c.bf16 %v50_v50, %v49_v49  ;;  %v52_v54 = vld [vmem:[%s1141_s0 + $0xf8] sm:$0xff]  ;;  %v796_v56 = vld [vmem:[%s1142_s3 + $0x30] sm:$0xff]   ;;  %v973_v58 = vld [vmem:[%s1143_s2] ss:$0 sm:$0xff] }
   0xf   :  { %727 = vmatpush3.bf16.msra.mxu0 %v791_v17  ;;  %v68_v55 = vpack.c.bf16 %v52_v54, %v51_v53  ;;  %v797_v57 = vld [vmem:[%s1142_s3 + $0x38] sm:$0xff]  }
  0x10   :  { %728 = vmatprep.subr.bf16.mxu0 %v792_v20  ;;  %782 = vmatpush3.bf16.msra.mxu1 %v792_v20 }
  0x11   :  { %775 = vmatprep.subr.bf16.mxu1 %v793_v24 }
  0x12   :  { %697 = vmatmul.mubr.msk.bf16.gmra.mrb[4].mxu0 %vm92_vm0, %v56_v16 }
  0x13   :  { %700 = vmatprep.mubr.msk.bf16.mxu0 %vm92_vm0, %v57_v18  ;;  %729 = vmatpush3.bf16.msra.mxu0 %v792_v20 }
  0x14   :  { %730 = vmatprep.subr.bf16.mxu0 %v793_v24  ;;  %783 = vmatpush3.bf16.msra.mxu1 %v793_v24 }
  0x15   :  { %776 = vmatprep.subr.bf16.mxu1 %v794_v27 }
  0x17   :  { %731 = vmatpush3.bf16.msra.mxu0 %v793_v24 }
  0x18   :  { %732 = vmatprep.subr.bf16.mxu0 %v794_v27  ;;  %784 = vmatpush3.bf16.msra.mxu1 %v794_v27 }
  0x19   :  { %777 = vmatprep.subr.bf16.mxu1 %v795_v32 }
  0x1a   :  { %701 = vmatmul.mubr.msk.bf16.gmra.mrb[8].mxu0 %vm92_vm0, %v58_v25 }
  0x1b   :  { %704 = vmatprep.mubr.msk.bf16.mxu0 %vm92_vm0, %v59_v26  ;;  %733 = vmatpush3.bf16.msra.mxu0 %v794_v27 }
  0x1c   :  { %734 = vmatprep.subr.bf16.mxu0 %v795_v32  ;;  %785 = vmatpush3.bf16.msra.mxu1 %v795_v32 }
  0x1d   :  { %778 = vmatprep.subr.bf16.mxu1 %v796_v56 }
  0x1f   :  { %735 = vmatpush3.bf16.msra.mxu0 %v795_v32 }
  0x20   :  { %736 = vmatprep.subr.bf16.mxu0 %v796_v56  ;;  %786 = vmatpush3.bf16.msra.mxu1 %v796_v56 }
  0x21   :  { %779 = vmatprep.subr.bf16.mxu1 %v797_v57 }
  0x22   :  { %705 = vmatmul.mubr.msk.bf16.gmra.mrb[12].mxu0 %vm92_vm0, %v60_v33 }
  0x23   :  { %708 = vmatprep.mubr.msk.bf16.mxu0 %vm92_vm0, %v61_v34  ;;  %737 = vmatpush3.bf16.msra.mxu0 %v796_v56 }
  0x24   :  { %738 = vmatprep.subr.bf16.mxu0 %v797_v57  ;;  %787 = vmatpush3.bf16.msra.mxu1 %v797_v57 }
  0x27   :  { %739 = vmatpush3.bf16.msra.mxu0 %v797_v57 }
  0x2a   :  { %709 = vmatmul.mubr.msk.bf16.gmra.mrb[16].mxu0 %vm92_vm0, %v62_v39 }
  0x2b   :  { %712 = vmatprep.mubr.msk.bf16.mxu0 %vm92_vm0, %v63_v40 }
  0x32   :  { %713 = vmatmul.mubr.msk.bf16.gmra.mrb[20].mxu0 %vm92_vm0, %v64_v45 }
  0x33   :  { %716 = vmatprep.mubr.msk.bf16.mxu0 %vm92_vm0, %v65_v46 }
  0x3a   :  { %717 = vmatmul.mubr.msk.bf16.gmra.mrb[24].mxu0 %vm92_vm0, %v66_v51 }
  0x3b   :  { %720 = vmatprep.mubr.msk.bf16.mxu0 %vm92_vm0, %v67_v52 }
  0x42   :  { %721 = vmatmul.mubr.msk.bf16.gmra.mrb[28].mxu0 %vm92_vm0, %v68_v55 }
  0xdd   :  { %v694_v59 = vpop.f32.mrb[0].mxu0 }
  0xde   :  { %v184_v60 = vadd.f32 %v694_v59, %v973_v58  ;;  %v175_v61 = vpop.f32.mrb[1].mxu0 }
  0xdf   :  { %v176_v62 = vadd.f32 %v973_v58, %v175_v61  ;;  %v695_v63 = vpop.f32.mrb[2].mxu0 }
  0xe0   :  { %v187_v0 = vadd.f32 %v695_v63, %v973_v58  ;;  %v178_v1 = vpop.f32.mrb[3].mxu0  ;;  %v304_v3 = vmax.f32 %v184_v60, 0.0 }
  0xe1   :  { %v179_v2 = vadd.f32 %v973_v58, %v178_v1  ;;  %v302_v5 = vmax.f32 %v176_v62, 0.0 }
  0xe2   :  { %v305_v4 = vmax.f32 %v187_v0, 0.0 }
  0xe3   :  { %v303_v6 = vmax.f32 %v179_v2, 0.0 }
  0xe4   :  { %v335_v7 = vpack.c.bf16 %v305_v4, %v304_v3 }
  0xe5   :  { %v334_v8 = vpack.c.bf16 %v303_v6, %v302_v5  ;;  %v698_v9 = vpop.f32.mrb[4].mxu0 }
  0xe6   :  { %v200_v10 = vadd.f32 %v698_v9, %v973_v58  ;;  %v191_v11 = vpop.f32.mrb[5].mxu0 }
  0xe7   :  { %v192_v12 = vadd.f32 %v973_v58, %v191_v11  ;;  %v699_v13 = vpop.f32.mrb[6].mxu0  ;;  %740 = vmatprep.mubr.bf16.mxu0 %v334_v8 }
  0xe8   :  { %v203_v14 = vadd.f32 %v699_v13, %v973_v58  ;;  %v194_v15 = vpop.f32.mrb[7].mxu0  ;;  %741 = vmatmul.mubr.bf16.vlgmr.msra.gmra.mrb[32].mxu0 %v335_v7  ;;  %v308_v17 = vmax.f32 %v200_v10, 0.0 }
  0xe9   :  { %v195_v16 = vadd.f32 %v973_v58, %v194_v15  ;;  %v306_v19 = vmax.f32 %v192_v12, 0.0 }
  0xea   :  { %v309_v18 = vmax.f32 %v203_v14, 0.0 }
  0xeb   :  { %v307_v20 = vmax.f32 %v195_v16, 0.0 }
  0xec   :  { %v337_v21 = vpack.c.bf16 %v309_v18, %v308_v17 }
  0xed   :  { %v702_v22 = vpop.f32.mrb[8].mxu0  ;;  %v336_v23 = vpack.c.bf16 %v307_v20, %v306_v19 }
  0xee   :  { %v216_v24 = vadd.f32 %v702_v22, %v973_v58  ;;  %v207_v25 = vpop.f32.mrb[9].mxu0 }
  0xef   :  { %v208_v26 = vadd.f32 %v973_v58, %v207_v25  ;;  %v703_v27 = vpop.f32.mrb[10].mxu0  ;;  %744 = vmatprep.mubr.bf16.mxu1 %v336_v23 }
  0xf0   :  { %v219_v28 = vadd.f32 %v703_v27, %v973_v58  ;;  %v210_v29 = vpop.f32.mrb[11].mxu0  ;;  %745 = vmatmul.mubr.bf16.vlgmr.msra.gmra.mrb[0].mxu1 %v337_v21  ;;  %v312_v31 = vmax.f32 %v216_v24, 0.0 }
  0xf1   :  { %v211_v30 = vadd.f32 %v973_v58, %v210_v29  ;;  %v310_v33 = vmax.f32 %v208_v26, 0.0 }
  0xf2   :  { %v313_v32 = vmax.f32 %v219_v28, 0.0 }
  0xf3   :  { %v311_v34 = vmax.f32 %v211_v30, 0.0 }
  0xf4   :  { %v339_v35 = vpack.c.bf16 %v313_v32, %v312_v31 }
  0xf5   :  { %v338_v36 = vpack.c.bf16 %v311_v34, %v310_v33  ;;  %v706_v37 = vpop.f32.mrb[12].mxu0 }
  0xf6   :  { %v232_v38 = vadd.f32 %v706_v37, %v973_v58  ;;  %v223_v39 = vpop.f32.mrb[13].mxu0 }
  0xf7   :  { %v224_v40 = vadd.f32 %v973_v58, %v223_v39  ;;  %v707_v41 = vpop.f32.mrb[14].mxu0  ;;  %748 = vmatprep.mubr.bf16.mxu1 %v338_v36 }
  0xf8   :  { %v235_v42 = vadd.f32 %v707_v41, %v973_v58  ;;  %v226_v43 = vpop.f32.mrb[15].mxu0  ;;  %749 = vmatmul.mubr.bf16.gmra.mrb[4].mxu1 %v339_v35  ;;  %v316_v45 = vmax.f32 %v232_v38, 0.0 }
  0xf9   :  { %v227_v44 = vadd.f32 %v973_v58, %v226_v43  ;;  %v314_v47 = vmax.f32 %v224_v40, 0.0 }
  0xfa   :  { %v317_v46 = vmax.f32 %v235_v42, 0.0 }
  0xfb   :  { %v315_v48 = vmax.f32 %v227_v44, 0.0  ;;  %v1010_v44 = vld [vmem:[%s1144_s4] ss:$0 sm:$0xff] }
  0xfc   :  { %v341_v49 = vpack.c.bf16 %v317_v46, %v316_v45 }
  0xfd   :  { %v340_v50 = vpack.c.bf16 %v315_v48, %v314_v47  ;;  %v710_v51 = vpop.f32.mrb[16].mxu0 }
  0xfe   :  { %v248_v52 = vadd.f32 %v710_v51, %v973_v58  ;;  %v239_v53 = vpop.f32.mrb[17].mxu0 }
  0xff   :  { %v240_v54 = vadd.f32 %v973_v58, %v239_v53  ;;  %v711_v55 = vpop.f32.mrb[18].mxu0  ;;  %752 = vmatprep.mubr.bf16.mxu1 %v340_v50 }
 0x100   :  { %v251_v56 = vadd.f32 %v711_v55, %v973_v58  ;;  %v242_v57 = vpop.f32.mrb[19].mxu0  ;;  %753 = vmatmul.mubr.bf16.gmra.mrb[8].mxu1 %v341_v49  ;;  %v320_v60 = vmax.f32 %v248_v52, 0.0 }
 0x101   :  { %v243_v59 = vadd.f32 %v973_v58, %v242_v57  ;;  %v318_v62 = vmax.f32 %v240_v54, 0.0 }
 0x102   :  { %v321_v61 = vmax.f32 %v251_v56, 0.0 }
 0x103   :  { %v319_v63 = vmax.f32 %v243_v59, 0.0 }
 0x104   :  { %v343_v0 = vpack.c.bf16 %v321_v61, %v320_v60 }
 0x105   :  { %v342_v1 = vpack.c.bf16 %v319_v63, %v318_v62  ;;  %v714_v2 = vpop.f32.mrb[20].mxu0 }
 0x106   :  { %v264_v3 = vadd.f32 %v714_v2, %v973_v58  ;;  %v255_v4 = vpop.f32.mrb[21].mxu0 }
 0x107   :  { %v256_v5 = vadd.f32 %v973_v58, %v255_v4  ;;  %v715_v6 = vpop.f32.mrb[22].mxu0  ;;  %756 = vmatprep.mubr.bf16.mxu1 %v342_v1 }
 0x108   :  { %v267_v7 = vadd.f32 %v715_v6, %v973_v58  ;;  %v258_v8 = vpop.f32.mrb[23].mxu0  ;;  %757 = vmatmul.mubr.bf16.gmra.mrb[12].mxu1 %v343_v0  ;;  %v324_v10 = vmax.f32 %v264_v3, 0.0 }
 0x109   :  { %v259_v9 = vadd.f32 %v973_v58, %v258_v8  ;;  %v322_v12 = vmax.f32 %v256_v5, 0.0 }
 0x10a   :  { %v325_v11 = vmax.f32 %v267_v7, 0.0 }
 0x10b   :  { %v323_v13 = vmax.f32 %v259_v9, 0.0 }
 0x10c   :  { %v345_v14 = vpack.c.bf16 %v325_v11, %v324_v10 }
 0x10d   :  { %v344_v15 = vpack.c.bf16 %v323_v13, %v322_v12  ;;  %v718_v16 = vpop.f32.mrb[24].mxu0 }
 0x10e   :  { %v280_v17 = vadd.f32 %v718_v16, %v973_v58  ;;  %v271_v18 = vpop.f32.mrb[25].mxu0 }
 0x10f   :  { %v272_v19 = vadd.f32 %v973_v58, %v271_v18  ;;  %v719_v20 = vpop.f32.mrb[26].mxu0  ;;  %760 = vmatprep.mubr.bf16.mxu1 %v344_v15 }
 0x110   :  { %v283_v21 = vadd.f32 %v719_v20, %v973_v58  ;;  %v274_v22 = vpop.f32.mrb[27].mxu0  ;;  %761 = vmatmul.mubr.bf16.gmra.mrb[16].mxu1 %v345_v14  ;;  %v328_v24 = vmax.f32 %v280_v17, 0.0 }
 0x111   :  { %v275_v23 = vadd.f32 %v973_v58, %v274_v22  ;;  %v326_v26 = vmax.f32 %v272_v19, 0.0 }
 0x112   :  { %v329_v25 = vmax.f32 %v283_v21, 0.0 }
 0x113   :  { %v327_v27 = vmax.f32 %v275_v23, 0.0 }
 0x114   :  { %v347_v28 = vpack.c.bf16 %v329_v25, %v328_v24 }
 0x115   :  { %v346_v29 = vpack.c.bf16 %v327_v27, %v326_v26  ;;  %v722_v30 = vpop.f32.mrb[28].mxu0 }
 0x116   :  { %v296_v31 = vadd.f32 %v722_v30, %v973_v58  ;;  %v287_v32 = vpop.f32.mrb[29].mxu0 }
 0x117   :  { %v288_v33 = vadd.f32 %v973_v58, %v287_v32  ;;  %v723_v34 = vpop.f32.mrb[30].mxu0  ;;  %764 = vmatprep.mubr.bf16.mxu1 %v346_v29 }
 0x118   :  { %v299_v35 = vadd.f32 %v723_v34, %v973_v58  ;;  %v290_v36 = vpop.f32.mrb[31].mxu0  ;;  %765 = vmatmul.mubr.bf16.gmra.mrb[20].mxu1 %v347_v28  ;;  %v332_v38 = vmax.f32 %v296_v31, 0.0 }
 0x119   :  { %v291_v37 = vadd.f32 %v973_v58, %v290_v36  ;;  %v330_v40 = vmax.f32 %v288_v33, 0.0 }
 0x11a   :  { %v333_v39 = vmax.f32 %v299_v35, 0.0 }
 0x11b   :  { %v331_v41 = vmax.f32 %v291_v37, 0.0 }
 0x11c   :  { %v349_v42 = vpack.c.bf16 %v333_v39, %v332_v38 }
 0x11d   :  { %v348_v43 = vpack.c.bf16 %v331_v41, %v330_v40 }
 0x11f   :  { %768 = vmatprep.mubr.bf16.mxu1 %v348_v43 }
 0x120   :  { %769 = vmatmul.mubr.bf16.gmra.mrb[24].mxu1 %v349_v42 }
 0x1bb   :  { %v742_v45 = vpop.f32.mrb[32].mxu0 }
 0x1bc   :  { %v464_v46 = vadd.f32 %v742_v45, %v1010_v44  ;;  %v455_v47 = vpop.f32.mrb[33].mxu0 }
 0x1bd   :  { %v456_v48 = vadd.f32 %v1010_v44, %v455_v47  ;;  %v743_v58 = vpop.f32.mrb[34].mxu0 }
 0x1be   :  { %584 = vst [vmem:[%s1145_s5 + $0x10] sm:$0xff] %v464_v46  ;;  %v467_v49 = vadd.f32 %v743_v58, %v1010_v44  ;;  %v458_v50 = vpop.f32.mrb[35].mxu0 }
 0x1bf   :  { %582 = vst [vmem:[%s1145_s5] sm:$0xff] %v456_v48  ;;  %v459_v51 = vadd.f32 %v1010_v44, %v458_v50 }
 0x1c0   :  { %585 = vst [vmem:[%s1145_s5 + $0x18] sm:$0xff] %v467_v49 }
 0x1c1   :  { %583 = vst [vmem:[%s1145_s5 + $0x8] sm:$0xff] %v459_v51 }
 0x1c3   :  { %v746_v52 = vpop.f32.mrb[0].mxu1 }
 0x1c4   :  { %v480_v53 = vadd.f32 %v746_v52, %v1010_v44  ;;  %v471_v54 = vpop.f32.mrb[1].mxu1 }
 0x1c5   :  { %v472_v55 = vadd.f32 %v1010_v44, %v471_v54  ;;  %v747_v56 = vpop.f32.mrb[2].mxu1 }
 0x1c6   :  { %588 = vst [vmem:[%s1145_s5 + $0x30] sm:$0xff] %v480_v53  ;;  %v483_v57 = vadd.f32 %v747_v56, %v1010_v44  ;;  %v474_v59 = vpop.f32.mrb[3].mxu1 }
 0x1c7   :  { %586 = vst [vmem:[%s1145_s5 + $0x20] sm:$0xff] %v472_v55  ;;  %v475_v60 = vadd.f32 %v1010_v44, %v474_v59 }
 0x1c8   :  { %589 = vst [vmem:[%s1145_s5 + $0x38] sm:$0xff] %v483_v57 }
 0x1c9   :  { %587 = vst [vmem:[%s1145_s5 + $0x28] sm:$0xff] %v475_v60 }
 0x1cb   :  { %v750_v61 = vpop.f32.mrb[4].mxu1 }
 0x1cc   :  { %v496_v62 = vadd.f32 %v750_v61, %v1010_v44  ;;  %v487_v63 = vpop.f32.mrb[5].mxu1 }
 0x1cd   :  { %v488_v0 = vadd.f32 %v1010_v44, %v487_v63  ;;  %v751_v1 = vpop.f32.mrb[6].mxu1 }
 0x1ce   :  { %592 = vst [vmem:[%s1145_s5 + $0x50] sm:$0xff] %v496_v62  ;;  %v499_v2 = vadd.f32 %v751_v1, %v1010_v44  ;;  %v490_v3 = vpop.f32.mrb[7].mxu1 }
 0x1cf   :  { %590 = vst [vmem:[%s1145_s5 + $0x40] sm:$0xff] %v488_v0  ;;  %v491_v4 = vadd.f32 %v1010_v44, %v490_v3 }
 0x1d0   :  { %593 = vst [vmem:[%s1145_s5 + $0x58] sm:$0xff] %v499_v2 }
 0x1d1   :  { %591 = vst [vmem:[%s1145_s5 + $0x48] sm:$0xff] %v491_v4 }
 0x1d3   :  { %v754_v5 = vpop.f32.mrb[8].mxu1 }
 0x1d4   :  { %v512_v6 = vadd.f32 %v754_v5, %v1010_v44  ;;  %v503_v7 = vpop.f32.mrb[9].mxu1 }
 0x1d5   :  { %v504_v8 = vadd.f32 %v1010_v44, %v503_v7  ;;  %v755_v9 = vpop.f32.mrb[10].mxu1 }
 0x1d6   :  { %596 = vst [vmem:[%s1145_s5 + $0x70] sm:$0xff] %v512_v6  ;;  %v515_v10 = vadd.f32 %v755_v9, %v1010_v44  ;;  %v506_v11 = vpop.f32.mrb[11].mxu1 }
 0x1d7   :  { %594 = vst [vmem:[%s1145_s5 + $0x60] sm:$0xff] %v504_v8  ;;  %v507_v12 = vadd.f32 %v1010_v44, %v506_v11 }
 0x1d8   :  { %597 = vst [vmem:[%s1145_s5 + $0x78] sm:$0xff] %v515_v10 }
 0x1d9   :  { %595 = vst [vmem:[%s1145_s5 + $0x68] sm:$0xff] %v507_v12 }
 0x1db   :  { %v758_v13 = vpop.f32.mrb[12].mxu1 }
 0x1dc   :  { %v528_v14 = vadd.f32 %v758_v13, %v1010_v44  ;;  %v519_v15 = vpop.f32.mrb[13].mxu1 }
 0x1dd   :  { %v520_v16 = vadd.f32 %v1010_v44, %v519_v15  ;;  %v759_v17 = vpop.f32.mrb[14].mxu1 }
 0x1de   :  { %600 = vst [vmem:[%s1145_s5 + $0x90] sm:$0xff] %v528_v14  ;;  %v531_v18 = vadd.f32 %v759_v17, %v1010_v44  ;;  %v522_v19 = vpop.f32.mrb[15].mxu1 }
 0x1df   :  { %598 = vst [vmem:[%s1145_s5 + $0x80] sm:$0xff] %v520_v16  ;;  %v523_v20 = vadd.f32 %v1010_v44, %v522_v19 }
 0x1e0   :  { %601 = vst [vmem:[%s1145_s5 + $0x98] sm:$0xff] %v531_v18 }
 0x1e1   :  { %599 = vst [vmem:[%s1145_s5 + $0x88] sm:$0xff] %v523_v20 }
 0x1e3   :  { %v762_v21 = vpop.f32.mrb[16].mxu1 }
 0x1e4   :  { %v544_v22 = vadd.f32 %v762_v21, %v1010_v44  ;;  %v535_v23 = vpop.f32.mrb[17].mxu1 }
 0x1e5   :  { %v536_v24 = vadd.f32 %v1010_v44, %v535_v23  ;;  %v763_v25 = vpop.f32.mrb[18].mxu1 }
 0x1e6   :  { %604 = vst [vmem:[%s1145_s5 + $0xb0] sm:$0xff] %v544_v22  ;;  %v547_v26 = vadd.f32 %v763_v25, %v1010_v44  ;;  %v538_v27 = vpop.f32.mrb[19].mxu1 }
 0x1e7   :  { %602 = vst [vmem:[%s1145_s5 + $0xa0] sm:$0xff] %v536_v24  ;;  %v539_v28 = vadd.f32 %v1010_v44, %v538_v27 }
 0x1e8   :  { %605 = vst [vmem:[%s1145_s5 + $0xb8] sm:$0xff] %v547_v26 }
 0x1e9   :  { %603 = vst [vmem:[%s1145_s5 + $0xa8] sm:$0xff] %v539_v28 }
 0x1eb   :  { %v766_v29 = vpop.f32.mrb[20].mxu1 }
 0x1ec   :  { %v560_v30 = vadd.f32 %v766_v29, %v1010_v44  ;;  %v551_v31 = vpop.f32.mrb[21].mxu1 }
 0x1ed   :  { %v552_v32 = vadd.f32 %v1010_v44, %v551_v31  ;;  %v767_v33 = vpop.f32.mrb[22].mxu1 }
 0x1ee   :  { %608 = vst [vmem:[%s1145_s5 + $0xd0] sm:$0xff] %v560_v30  ;;  %v563_v34 = vadd.f32 %v767_v33, %v1010_v44  ;;  %v554_v35 = vpop.f32.mrb[23].mxu1 }
 0x1ef   :  { %606 = vst [vmem:[%s1145_s5 + $0xc0] sm:$0xff] %v552_v32  ;;  %v555_v36 = vadd.f32 %v1010_v44, %v554_v35 }
 0x1f0   :  { %609 = vst [vmem:[%s1145_s5 + $0xd8] sm:$0xff] %v563_v34 }
 0x1f1   :  { %607 = vst [vmem:[%s1145_s5 + $0xc8] sm:$0xff] %v555_v36 }
 0x1f3   :  { %v770_v37 = vpop.f32.mrb[24].mxu1 }
 0x1f4   :  { %v576_v38 = vadd.f32 %v770_v37, %v1010_v44  ;;  %v567_v39 = vpop.f32.mrb[25].mxu1 }
 0x1f5   :  { %v568_v40 = vadd.f32 %v1010_v44, %v567_v39  ;;  %v771_v41 = vpop.f32.mrb[26].mxu1 }
 0x1f6   :  { %612 = vst [vmem:[%s1145_s5 + $0xf0] sm:$0xff] %v576_v38  ;;  %v579_v42 = vadd.f32 %v771_v41, %v1010_v44  ;;  %v570_v43 = vpop.f32.mrb[27].mxu1 }
 0x1f7   :  { %610 = vst [vmem:[%s1145_s5 + $0xe0] sm:$0xff] %v568_v40  ;;  %v571_v45 = vadd.f32 %v1010_v44, %v570_v43 }
 0x1f8   :  { %613 = vst [vmem:[%s1145_s5 + $0xf8] sm:$0xff] %v579_v42 }
 0x1f9   :  { %611 = vst [vmem:[%s1145_s5 + $0xe8] sm:$0xff] %v571_v45 }

</bundles_post_ra>
